<compile_context>
chip_gen: v5e
topology: v5e:2x2
jax: 0.10.0
libtpu: 0.0.40
codegen_flags: <defaults>
</compile_context>

<pallas_src>
import numpy as np
import jax
import jax.numpy as jnp
from jax import lax
from jax.experimental import pallas as pl
from jax.experimental.pallas import tpu as pltpu

EPS = 1e-5
NEG_SLOPE = 0.1


def _fused_convT_bn_lrelu_kernel(x_ref, w_ref, g_ref, b_ref, o_ref):
    """Fused phase-decomposed ConvTranspose2d + BatchNorm2d(train) + LeakyReLU(0.1).

       x_ref: (n_ph*Kp, M)          bf16  stacked per-phase im2col, M = N*Qh*Qw lane-dense
       w_ref: (n_ph*C_out, n_ph*Kp) bf16  block-diagonal per-phase weights
       g_ref, b_ref: (C_out, 1)     f32   BatchNorm gamma / beta
       o_ref: (n_ph*C_out, M)       bf16  phase-major normalized + activated output
    """
    c_out = g_ref.shape[0]
    rows, m = o_ref.shape
    n_ph = rows // c_out
    inv_m = 1.0 / float(n_ph * m)          # BN averages over all N*Ho*Wo output pixels

    # ONE block-diagonal MXU matmul (bf16 in, f32 accumulate) instead of n_ph tiny dots.
    y = jnp.dot(w_ref[...], x_ref[...], preferred_element_type=jnp.float32)  # (rows, m) f32

    # Single-pass batch statistics (f32 accumulators): per-(phase,channel) lane reduces,
    # then fold the n_ph phase blocks into per-channel sums.
    rs = jnp.sum(y, axis=1, keepdims=True)        # (rows, 1)  sum(y)
    rq = jnp.sum(y * y, axis=1, keepdims=True)    # (rows, 1)  sum(y^2)
    ssum = jnp.zeros((c_out, 1), jnp.float32)
    ssq = jnp.zeros((c_out, 1), jnp.float32)
    for ph in range(n_ph):                        # static unroll (n_ph = stride^2 = 4)
        ssum = ssum + rs[ph * c_out:(ph + 1) * c_out]
        ssq = ssq + rq[ph * c_out:(ph + 1) * c_out]
    mean = ssum * inv_m
    var = jnp.maximum(ssq * inv_m - mean * mean, 0.0)   # f32 accum; clamp tiny negatives

    # BatchNorm affine folded into one scale/shift per (phase, channel) row.
    scale = g_ref[...] * lax.rsqrt(var + EPS)     # (C_out, 1)
    shift = b_ref[...] - mean * scale
    scale_r = jnp.tile(scale, (n_ph, 1))          # (rows, 1)
    shift_r = jnp.tile(shift, (n_ph, 1))

    # Fused affine + LeakyReLU(0.1) (max form), one lane-dense bf16 store.
    z = y * scale_r + shift_r
    o_ref[...] = jnp.maximum(z, NEG_SLOPE * z).astype(o_ref.dtype)


def conv_transpose2d_block(x, w_t, gamma, beta, *, stride, padding):
    """x: [N, C_in, H, W] (NCHW); w_t: PyTorch ConvTranspose2d weight [C_in, C_out, kh, kw];
    gamma/beta: [C_out]. Returns NCHW bfloat16 (BatchNorm evaluated in training mode)."""
    N, C_in, H, W = x.shape
    C_in_w, C_out, kh, kw = w_t.shape
    assert C_in == C_in_w
    s, p = int(stride), int(padding)
    Ho = (H - 1) * s - 2 * p + kh
    Wo = (W - 1) * s - 2 * p + kw

    # Sub-pixel (phase) decomposition prerequisites (canonical k=2s, p=s//2 upsample block).
    assert kh % s == 0 and kw % s == 0, "phase decomposition needs kernel % stride == 0"
    assert Ho % s == 0 and Wo % s == 0
    Th, Tw = kh // s, kw // s            # taps per phase per spatial dim
    Qh, Qw = Ho // s, Wo // s            # per-phase output grid
    Mp = N * Qh * Qw                     # matmul lane dim (512 here, multiple of 128)
    Kp = C_in * Th * Tw                  # per-phase contraction depth (16 here)
    n_ph = s * s

    # ---- wrapper glue: a handful of HLOs, all data movement in bf16 ----
    # One fused patch-extraction op replaces the old nested-python im2col.
    # patches[n, c*Th*Tw + u*Tw + v, gh, gw] = x_pad[n, c, gh + u, gw + v]  (pad = Th/Tw)
    x_bf = x.astype(jnp.bfloat16)
    patches = lax.conv_general_dilated_patches(
        x_bf, filter_shape=(Th, Tw), window_strides=(1, 1),
        padding=((Th, Th), (Tw, Tw)),
        dimension_numbers=('NCHW', 'OIHW', 'NCHW'),
    )  # (N, Kp, H+Th+1, W+Tw+1)

    # Per-phase windows differ only by a (d0h, d0w) offset into the patch grid.
    x_list = []
    for rh in range(s):
        d0h = (rh + p) // s
        for rw in range(s):
            d0w = (rw + p) // s
            x_list.append(lax.slice(
                patches, (0, 0, d0h + 1, d0w + 1),
                (N, Kp, d0h + 1 + Qh, d0w + 1 + Qw)))            # (N, Kp, Qh, Qw)
    x_all = jnp.stack(x_list, 0)                                  # (n_ph, N, Kp, Qh, Qw)
    x_all = x_all.transpose(0, 2, 1, 3, 4).reshape(n_ph * Kp, Mp)

    # Per-phase kernel taps gathered in ONE indexing op. Patch-window offset u maps to
    # transposed-conv tap i = i0 + (T-1-u)*s (window rows increase while the tap decreases).
    i_idx = np.array([[(rh + p) % s + (Th - 1 - u) * s for u in range(Th)]
                      for rh in range(s)], dtype=np.int32)       # (s, Th)
    j_idx = np.array([[(rw + p) % s + (Tw - 1 - v) * s for v in range(Tw)]
                      for rw in range(s)], dtype=np.int32)       # (s, Tw)
    w_g = w_t[:, :, i_idx[:, None, :, None], j_idx[None, :, None, :]]  # (C_in,C_out,s,s,Th,Tw)
    w_ph = jnp.transpose(w_g, (2, 3, 1, 0, 4, 5)).reshape(n_ph, C_out, Kp)
    # Block-diagonal LHS -> one (n_ph*C_out, n_ph*Kp) matmul instead of n_ph tiny dots.
    w_bd = jnp.einsum('pq,pok->poqk', jnp.eye(n_ph, dtype=w_ph.dtype), w_ph)
    w_bd = w_bd.reshape(n_ph * C_out, n_ph * Kp).astype(jnp.bfloat16)

    g2 = gamma.reshape(C_out, 1).astype(jnp.float32)
    b2 = beta.reshape(C_out, 1).astype(jnp.float32)

    # Everything fits easily in VMEM (~200 KiB total) -> gridless call, whole arrays in
    # VMEM, no pipeline / double-buffer overhead.
    # TODO(synk): at large N*H*W, split Mp over a "parallel" grid axis (v7x megacore) with
    # per-block partial (sum, sumsq) outputs + a tiny finalize pass, budgeted for 64 MiB VMEM.
    out = pl.pallas_call(
        _fused_convT_bn_lrelu_kernel,
        out_shape=jax.ShapeDtypeStruct((n_ph * C_out, Mp), jnp.bfloat16),
        in_specs=[
            pl.BlockSpec(memory_space=pltpu.MemorySpace.VMEM),
            pl.BlockSpec(memory_space=pltpu.MemorySpace.VMEM),
            pl.BlockSpec(memory_space=pltpu.MemorySpace.VMEM),
            pl.BlockSpec(memory_space=pltpu.MemorySpace.VMEM),
        ],
        out_specs=pl.BlockSpec(memory_space=pltpu.MemorySpace.VMEM),
    )(x_all, w_bd, g2, b2)

    # Pixel shuffle (phase interleave) on bf16: (rh, rw, co, n, qh, qw) -> NCHW.
    # TODO(synk): fuse this interleave into the downstream consumer to avoid the
    # non-lane-dense scatter at large sizes.
    out = out.reshape(s, s, C_out, N, Qh, Qw).transpose(3, 2, 4, 0, 5, 1)
    return out.reshape(N, C_out, Ho, Wo)


def _reference(x, w_t, gamma, beta, *, stride, padding):
    """Pure-JAX f32 reference with identical semantics (sanity check)."""
    C_in, C_out, kh, kw = w_t.shape
    s, p = stride, padding
    w_eq = jnp.flip(w_t, axis=(2, 3)).transpose(1, 0, 2, 3)  # [C_out, C_in, kh, kw]
    y = lax.conv_general_dilated(
        x, w_eq, window_strides=(1, 1),
        padding=[(kh - 1 - p, kh - 1 - p), (kw - 1 - p, kw - 1 - p)],
        lhs_dilation=(s, s),
        dimension_numbers=('NCHW', 'OIHW', 'NCHW'),
        precision=lax.Precision.HIGHEST)
    mean = y.mean(axis=(0, 2, 3), keepdims=True)
    var = y.var(axis=(0, 2, 3), keepdims=True)
    z = (y - mean) / jnp.sqrt(var + EPS)
    z = z * gamma[None, :, None, None] + beta[None, :, None, None]
    return jnp.where(z >= 0, z, NEG_SLOPE * z)


if __name__ == "__main__":
    # ConvTranspose2dBlock(in_channels=4, out_channels=8,
    #                      kernel_size=4, stride=2, padding=1)
    N, C_in, H, W = 2, 4, 16, 16
    C_out, kh, kw = 8, 4, 4
    stride, padding = 2, 1

    key = jax.random.PRNGKey(0)
    kx, kw_, kg, kb = jax.random.split(key, 4)
    x = jax.random.normal(kx, (N, C_in, H, W), jnp.float32)
    # PyTorch ConvTranspose2d weight layout: [C_in, C_out, kh, kw]
    w_t = 0.1 * jax.random.normal(kw_, (C_in, C_out, kh, kw), jnp.float32)
    gamma = 1.0 + 0.1 * jax.random.normal(kg, (C_out,), jnp.float32)
    beta = 0.1 * jax.random.normal(kb, (C_out,), jnp.float32)

    run = jax.jit(conv_transpose2d_block, static_argnames=("stride", "padding"))
    out = run(x, w_t, gamma, beta, stride=stride, padding=padding)
    out = jax.block_until_ready(out)

    ref = _reference(x, w_t, gamma, beta, stride=stride, padding=padding)
    assert out.shape == (N, C_out, (H - 1) * stride - 2 * padding + kh,
                         (W - 1) * stride - 2 * padding + kw)
    out_f32 = out.astype(jnp.float32)
    # bf16 MXU inputs + bf16 output vs. the f32 reference -> relaxed tolerance.
    assert bool(jnp.allclose(out_f32, ref, atol=3e-2, rtol=3e-2)), \
        float(jnp.max(jnp.abs(out_f32 - ref)))

    print("KERNEL_OK")
</pallas_src>

<mosaic_0001>
module attributes {stable_mosaic.version = 11 : i64} {
  func.func @_fused_convT_bn_lrelu_kernel(%arg0: memref<64x512xbf16, #tpu.memory_space<vmem>>, %arg1: memref<32x64xbf16, #tpu.memory_space<vmem>>, %arg2: memref<8x1xf32, #tpu.memory_space<vmem>>, %arg3: memref<8x1xf32, #tpu.memory_space<vmem>>, %arg4: memref<32x512xbf16, #tpu.memory_space<vmem>>) attributes {dimension_semantics = [], scalar_prefetch = 0 : i64, scratch_operands = 0 : i64, tpu.core_type = #tpu.core_type<tc>} {
    %c0 = arith.constant 0 : index
    %c0_0 = arith.constant 0 : index
    %0 = vector.load %arg1[%c0, %c0_0] : memref<32x64xbf16, #tpu.memory_space<vmem>>, vector<32x64xbf16>
    %c0_1 = arith.constant 0 : index
    %c0_2 = arith.constant 0 : index
    %1 = vector.load %arg0[%c0_1, %c0_2] : memref<64x512xbf16, #tpu.memory_space<vmem>>, vector<64x512xbf16>
    %cst = arith.constant dense<0.000000e+00> : vector<32x512xf32>
    %2 = tpu.matmul %0, %1, %cst {dimension_numbers = #tpu.dot_dimension_numbers<[1], [0], [0], [1], [0, 0, 1, 1], [], []>} : vector<32x64xbf16>, vector<64x512xbf16>, vector<32x512xf32> -> vector<32x512xf32>
    %cst_3 = arith.constant dense<0.000000e+00> : vector<32xf32>
    %3 = vector.multi_reduction <add>, %2, %cst_3 [1] : vector<32x512xf32> to vector<32xf32>
    %4 = vector.shape_cast %3 : vector<32xf32> to vector<32x1xf32>
    %5 = arith.mulf %2, %2 : vector<32x512xf32>
    %cst_4 = arith.constant dense<0.000000e+00> : vector<32xf32>
    %6 = vector.multi_reduction <add>, %5, %cst_4 [1] : vector<32x512xf32> to vector<32xf32>
    %7 = vector.shape_cast %6 : vector<32xf32> to vector<32x1xf32>
    %cst_5 = arith.constant 0.000000e+00 : f32
    %8 = vector.broadcast %cst_5 : f32 to vector<8x1xf32>
    %cst_6 = arith.constant 0.000000e+00 : f32
    %9 = vector.broadcast %cst_6 : f32 to vector<8x1xf32>
    %10 = vector.extract_strided_slice %4 {offsets = [0, 0], sizes = [8, 1], strides = [1, 1]} : vector<32x1xf32> to vector<8x1xf32>
    %11 = arith.addf %8, %10 : vector<8x1xf32>
    %12 = vector.extract_strided_slice %7 {offsets = [0, 0], sizes = [8, 1], strides = [1, 1]} : vector<32x1xf32> to vector<8x1xf32>
    %13 = arith.addf %9, %12 : vector<8x1xf32>
    %14 = vector.extract_strided_slice %4 {offsets = [8, 0], sizes = [8, 1], strides = [1, 1]} : vector<32x1xf32> to vector<8x1xf32>
    %15 = arith.addf %11, %14 : vector<8x1xf32>
    %16 = vector.extract_strided_slice %7 {offsets = [8, 0], sizes = [8, 1], strides = [1, 1]} : vector<32x1xf32> to vector<8x1xf32>
    %17 = arith.addf %13, %16 : vector<8x1xf32>
    %18 = vector.extract_strided_slice %4 {offsets = [16, 0], sizes = [8, 1], strides = [1, 1]} : vector<32x1xf32> to vector<8x1xf32>
    %19 = arith.addf %15, %18 : vector<8x1xf32>
    %20 = vector.extract_strided_slice %7 {offsets = [16, 0], sizes = [8, 1], strides = [1, 1]} : vector<32x1xf32> to vector<8x1xf32>
    %21 = arith.addf %17, %20 : vector<8x1xf32>
    %22 = vector.extract_strided_slice %4 {offsets = [24, 0], sizes = [8, 1], strides = [1, 1]} : vector<32x1xf32> to vector<8x1xf32>
    %23 = arith.addf %19, %22 : vector<8x1xf32>
    %24 = vector.extract_strided_slice %7 {offsets = [24, 0], sizes = [8, 1], strides = [1, 1]} : vector<32x1xf32> to vector<8x1xf32>
    %25 = arith.addf %21, %24 : vector<8x1xf32>
    %cst_7 = arith.constant 4.8828125E-4 : f32
    %26 = vector.broadcast %cst_7 : f32 to vector<8x1xf32>
    %27 = arith.mulf %23, %26 : vector<8x1xf32>
    %cst_8 = arith.constant 4.8828125E-4 : f32
    %28 = vector.broadcast %cst_8 : f32 to vector<8x1xf32>
    %29 = arith.mulf %25, %28 : vector<8x1xf32>
    %30 = arith.mulf %27, %27 : vector<8x1xf32>
    %31 = arith.subf %29, %30 : vector<8x1xf32>
    %cst_9 = arith.constant 0.000000e+00 : f32
    %32 = vector.broadcast %cst_9 : f32 to vector<8x1xf32>
    %33 = arith.maximumf %31, %32 : vector<8x1xf32>
    %c0_10 = arith.constant 0 : index
    %c0_11 = arith.constant 0 : index
    %34 = vector.load %arg2[%c0_10, %c0_11] : memref<8x1xf32, #tpu.memory_space<vmem>>, vector<8x1xf32>
    %cst_12 = arith.constant 9.99999974E-6 : f32
    %35 = vector.broadcast %cst_12 : f32 to vector<8x1xf32>
    %36 = arith.addf %33, %35 : vector<8x1xf32>
    %37 = math.rsqrt %36 : vector<8x1xf32>
    %38 = arith.mulf %34, %37 : vector<8x1xf32>
    %c0_13 = arith.constant 0 : index
    %c0_14 = arith.constant 0 : index
    %39 = vector.load %arg3[%c0_13, %c0_14] : memref<8x1xf32, #tpu.memory_space<vmem>>, vector<8x1xf32>
    %40 = arith.mulf %27, %38 : vector<8x1xf32>
    %41 = arith.subf %39, %40 : vector<8x1xf32>
    %42 = tpu.concatenate %38, %38, %38, %38 in 0 : vector<8x1xf32>, vector<8x1xf32>, vector<8x1xf32>, vector<8x1xf32> -> vector<32x1xf32>
    %43 = tpu.concatenate %41, %41, %41, %41 in 0 : vector<8x1xf32>, vector<8x1xf32>, vector<8x1xf32>, vector<8x1xf32> -> vector<32x1xf32>
    %44 = vector.broadcast %42 : vector<32x1xf32> to vector<32x512xf32>
    %45 = arith.mulf %2, %44 : vector<32x512xf32>
    %46 = vector.broadcast %43 : vector<32x1xf32> to vector<32x512xf32>
    %47 = arith.addf %45, %46 : vector<32x512xf32>
    %cst_15 = arith.constant 1.000000e-01 : f32
    %48 = vector.broadcast %cst_15 : f32 to vector<32x512xf32>
    %49 = arith.mulf %48, %47 : vector<32x512xf32>
    %50 = arith.maximumf %47, %49 : vector<32x512xf32>
    %51 = arith.truncf %50 : vector<32x512xf32> to vector<32x512xbf16>
    %c0_16 = arith.constant 0 : index
    %c0_17 = arith.constant 0 : index
    %52 = vector.load %arg4[%c0_16, %c0_17] : memref<32x512xbf16, #tpu.memory_space<vmem>>, vector<32x512xbf16>
    tpu.vector_store %arg4[%c0_16, %c0_17], %51 {strides = array<i32>} : memref<32x512xbf16, #tpu.memory_space<vmem>>, vector<32x512xbf16>,
    return
  }
}

</mosaic_0001>

<bundles_post_ra>
// kernel: conv_transpose2d_block.1
= control target key start
LH: loop header
LB: loop body
LE: loop exit
PB: predicated region body
PF: predicated region fallthrough
CT: control target
= control target key end

     0   :  { %vm128_vm0 = vcmask 523264   ;;  %s747_s0 = inlined_call_operand.vmem [shape: bf16[64,512], index: 0, kind: input, shape index: {}]   ;;  %s748_s1 = inlined_call_operand.vmem [shape: bf16[32,64], index: 1, kind: input, shape index: {}]   ;;  %s749_s2 = inlined_call_operand.vmem [shape: f32[8,1], index: 2, kind: input, shape index: {}]   ;;  %s750_s3 = inlined_call_operand.vmem [shape: f32[8,1], index: 3, kind: input, shape index: {}]   ;;  %s751_s4 = inlined_call_operand.vmem [shape: bf16[32,512], index: 4, kind: output, shape index: {}]  }
   0x1   :  { %v448_v0 = vld [vmem:[%s747_s0 + $0x60] sm:$0xf]  ;;  %v486_v1 = vld [vmem:[%s747_s0 + $0x6c] sm:$0xf0]  ;;  %v484_v2 = vld [vmem:[%s747_s0 + $0x64] sm:$0xf] }
   0x2   :  { %v449_v3 = vor.u32 %v486_v1, %v448_v0  ;;  %v450_v4 = vld [vmem:[%s747_s0 + $0x70] sm:$0xf0]  ;;  %v456_v5 = vld [vmem:[%s747_s0 + $0x68] sm:$0xf]  ;;  %v487_v6 = vld [vmem:[%s747_s0 + $0x74] sm:$0xf0] }
   0x3   :  { %v453_v7 = vor.u32 %v484_v2, %v450_v4  ;;  %v457_v8 = vor.u32 %v487_v6, %v456_v5  ;;  %v485_v9 = vld [vmem:[%s747_s0 + $0x6c] sm:$0xf]  ;;  %v458_v10 = vld [vmem:[%s747_s0 + $0x78] sm:$0xf0]  ;;  %v432_v11 = vld [vmem:[%s747_s0 + $0x40] sm:$0xf] }
   0x4   :  { %139 = vmatpush.bf16.msra.mxu0 %v449_v3  ;;  %v461_v12 = vor.u32 %v485_v9, %v458_v10  ;;  %v482_v13 = vld [vmem:[%s747_s0 + $0x4c] sm:$0xf0]  ;;  %v480_v14 = vld [vmem:[%s747_s0 + $0x44] sm:$0xf]  ;;  %v434_v15 = vld [vmem:[%s747_s0 + $0x50] sm:$0xf0] }
   0x5   :  { %158 = vmatpush.bf16.msra.mxu1 %v453_v7  ;;  %177 = vmatpush.bf16.msra.mxu2 %v457_v8  ;;  %v433_v16 = vor.u32 %v482_v13, %v432_v11  ;;  %v437_v17 = vor.u32 %v480_v14, %v434_v15  ;;  %v440_v18 = vld [vmem:[%s747_s0 + $0x48] sm:$0xf]  ;;  %v483_v19 = vld [vmem:[%s747_s0 + $0x54] sm:$0xf0]  ;;  %v481_v20 = vld [vmem:[%s747_s0 + $0x4c] sm:$0xf] }
   0x6   :  { %196 = vmatpush.bf16.msra.mxu3 %v461_v12  ;;  %v441_v21 = vor.u32 %v483_v19, %v440_v18  ;;  %v442_v22 = vld [vmem:[%s747_s0 + $0x58] sm:$0xf0]  ;;  %v416_v23 = vld [vmem:[%s747_s0 + $0x20] sm:$0xf]  ;;  %v478_v24 = vld [vmem:[%s747_s0 + $0x2c] sm:$0xf0] }
   0x7   :  { %v445_v25 = vor.u32 %v481_v20, %v442_v22  ;;  %v476_v26 = vld [vmem:[%s747_s0 + $0x24] sm:$0xf]  ;;  %v418_v27 = vld [vmem:[%s747_s0 + $0x30] sm:$0xf0]  ;;  %v424_v28 = vld [vmem:[%s747_s0 + $0x28] sm:$0xf]  ;;  %v417_v29 = vor.u32 %v478_v24, %v416_v23 }
   0x8   :  { %140 = vmatpush.bf16.msra.mxu0 %v433_v16  ;;  %v479_v30 = vld [vmem:[%s747_s0 + $0x34] sm:$0xf0]  ;;  %v477_v31 = vld [vmem:[%s747_s0 + $0x2c] sm:$0xf]  ;;  %v426_v32 = vld [vmem:[%s747_s0 + $0x38] sm:$0xf0]  ;;  %v421_v33 = vor.u32 %v476_v26, %v418_v27 }
   0x9   :  { %159 = vmatpush.bf16.msra.mxu1 %v437_v17  ;;  %178 = vmatpush.bf16.msra.mxu2 %v441_v21  ;;  %v425_v34 = vor.u32 %v479_v30, %v424_v28  ;;  %v400_v35 = vld [vmem:[%s747_s0] sm:$0xf]  ;;  %v474_v36 = vld [vmem:[%s747_s0 + $0xc] sm:$0xf0]  ;;  %v472_v37 = vld [vmem:[%s747_s0 + $0x4] sm:$0xf]  ;;  %v429_v38 = vor.u32 %v477_v31, %v426_v32 }
   0xa   :  { %197 = vmatpush.bf16.msra.mxu3 %v445_v25  ;;  %v402_v39 = vld [vmem:[%s747_s0 + $0x10] sm:$0xf0]  ;;  %v408_v40 = vld [vmem:[%s747_s0 + $0x8] sm:$0xf]  ;;  %v475_v41 = vld [vmem:[%s747_s0 + $0x14] sm:$0xf0]  ;;  %v401_v44 = vor.u32 %v474_v36, %v400_v35 }
   0xb   :  { %v473_v42 = vld [vmem:[%s747_s0 + $0xc] sm:$0xf]  ;;  %v410_v43 = vld [vmem:[%s747_s0 + $0x18] sm:$0xf0]  ;;  %v405_v45 = vor.u32 %v472_v37, %v402_v39  ;;  %v409_v46 = vor.u32 %v475_v41, %v408_v40  ;;  %v470_v48 = vld [vmem:[%s748_s1] sm:$0xff] }
   0xc   :  { %141 = vmatpush.bf16.msra.mxu0 %v417_v29  ;;  %v413_v47 = vor.u32 %v473_v42, %v410_v43  ;;  %v471_v49 = vld [vmem:[%s748_s1 + $0x8] sm:$0xff] }
   0xd   :  { %160 = vmatpush.bf16.msra.mxu1 %v421_v33  ;;  %179 = vmatpush.bf16.msra.mxu2 %v425_v34 }
   0xe   :  { %198 = vmatpush.bf16.msra.mxu3 %v429_v38 }
  0x10   :  { %142 = vmatpush.bf16.msra.mxu0 %v401_v44 }
  0x11   :  { %161 = vmatpush.bf16.msra.mxu1 %v405_v45  ;;  %180 = vmatpush.bf16.msra.mxu2 %v409_v46  ;;  %v493_v46 = vmov 0  }
  0x12   :  { %199 = vmatpush.bf16.msra.mxu3 %v413_v47  ;;  %489 = vset.pattern.permute.xlu2 %v493_v46 }
  0x13   :  { %462 = vmatmul.msk.bf16.vlgmr.msra.gmra.mxu0 %vm128_vm0, %v470_v48  ;;  %490 = vset.pattern.permute.xlu0 %v493_v46 }
  0x14   :  { %464 = vmatmul.msk.bf16.vlgmr.msra.gmra.mxu1 %vm128_vm0, %v470_v48  ;;  %466 = vmatmul.msk.bf16.vlgmr.msra.gmra.mxu2 %vm128_vm0, %v470_v48 }
  0x15   :  { %468 = vmatmul.msk.bf16.vlgmr.msra.gmra.mxu3 %vm128_vm0, %v470_v48 }
  0x23   :  { %463 = vmatmul.msk.bf16.gmra.mxu0 %vm128_vm0, %v471_v49 }
  0x24   :  { %465 = vmatmul.msk.bf16.gmra.mxu1 %vm128_vm0, %v471_v49  ;;  %467 = vmatmul.msk.bf16.gmra.mxu2 %vm128_vm0, %v471_v49 }
  0x25   :  { %469 = vmatmul.msk.bf16.gmra.mxu3 %vm128_vm0, %v471_v49 }
  0x90   :  { %v621_v50 = vpop.f32.mrf.mxu0 }
  0x91   :  { %v623_v51 = vpop.f32.mrf.mxu1  ;;  %v231_v52 = vmul.f32 %v621_v50, %v621_v50 }
  0x92   :  { %v232_v53 = vmul.f32 %v623_v51, %v623_v51  ;;  %v211_v54 = vadd.f32 %v623_v51, %v621_v50 }
  0x94   :  { %v247_v55 = vadd.f32 %v232_v53, %v231_v52 }
  0x97   :  { %v631_v56 = vpop.f32.mrf.mxu2 }
  0x98   :  { %v233_v57 = vmul.f32 %v631_v56, %v631_v56  ;;  %v635_v58 = vpop.f32.mrf.mxu3  ;;  %v637_v59 = vpop.f32.mrf.mxu0  ;;  %v212_v60 = vadd.f32 %v211_v54, %v631_v56 }
  0x99   :  { %v640_v61 = vpop.f32.mrf.mxu1  ;;  %v234_v62 = vmul.f32 %v635_v58, %v635_v58  ;;  %v235_v1 = vmul.f32 %v637_v59, %v637_v59 }
  0x9a   :  { %v213_v63 = vadd.f32 %v212_v60, %v635_v58  ;;  %v248_v0 = vadd.f32 %v247_v55, %v233_v57  ;;  %v236_v2 = vmul.f32 %v640_v61, %v640_v61  ;;  %v216_v4 = vadd.f32 %v640_v61, %v637_v59 }
  0x9c   :  { %214 = vadd.xlane.f32.xlu0 %v213_v63  ;;  %v249_v3 = vadd.f32 %v248_v0, %v234_v62  ;;  %v252_v10 = vadd.f32 %v236_v2, %v235_v1 }
  0x9e   :  { %250 = vadd.xlane.f32.xlu1 %v249_v3 }
  0x9f   :  { %v651_v5 = vpop.f32.mrf.mxu2 }
  0xa0   :  { %v237_v6 = vmul.f32 %v651_v5, %v651_v5  ;;  %v655_v7 = vpop.f32.mrf.mxu3  ;;  %v657_v8 = vpop.f32.mrf.mxu0  ;;  %v217_v9 = vadd.f32 %v216_v4, %v651_v5 }
  0xa1   :  { %v239_v11 = vmul.f32 %v657_v8, %v657_v8  ;;  %v662_v12 = vpop.f32.mrf.mxu1  ;;  %v238_v15 = vmul.f32 %v655_v7, %v655_v7 }
  0xa2   :  { %v240_v13 = vmul.f32 %v662_v12, %v662_v12  ;;  %v218_v14 = vadd.f32 %v217_v9, %v655_v7  ;;  %v253_v16 = vadd.f32 %v252_v10, %v237_v6  ;;  %v221_v17 = vadd.f32 %v662_v12, %v657_v8 }
  0xa4   :  { %219 = vadd.xlane.f32.xlu0 %v218_v14  ;;  %v254_v18 = vadd.f32 %v253_v16, %v238_v15  ;;  %v257_v19 = vadd.f32 %v240_v13, %v239_v11  ;;  %v280_v14 = vld [vmem:[%s749_s2] sm:$0xff] }
  0xa6   :  { %255 = vadd.xlane.f32.xlu2 %v254_v18  ;;  %v293_v18 = vld [vmem:[%s750_s3] sm:$0xff] }
  0xa7   :  { %v671_v20 = vpop.f32.mrf.mxu2 }
  0xa8   :  { %v241_v21 = vmul.f32 %v671_v20, %v671_v20  ;;  %v675_v22 = vpop.f32.mrf.mxu3  ;;  %v222_v23 = vadd.f32 %v221_v17, %v671_v20  ;;  %v678_v24 = vpop.f32.mrf.mxu0 }
  0xa9   :  { %v680_v25 = vpop.f32.mrf.mxu1  ;;  %v242_v26 = vmul.f32 %v675_v22, %v675_v22  ;;  %v243_v29 = vmul.f32 %v678_v24, %v678_v24 }
  0xaa   :  { %v223_v27 = vadd.f32 %v222_v23, %v675_v22  ;;  %v258_v28 = vadd.f32 %v257_v19, %v241_v21  ;;  %v244_v30 = vmul.f32 %v680_v25, %v680_v25  ;;  %v226_v32 = vadd.f32 %v680_v25, %v678_v24 }
  0xac   :  { %224 = vadd.xlane.f32.xlu1 %v223_v27  ;;  %v259_v31 = vadd.f32 %v258_v28, %v242_v26  ;;  %v262_v34 = vadd.f32 %v244_v30, %v243_v29 }
  0xae   :  { %260 = vadd.xlane.f32.xlu0 %v259_v31 }
  0xaf   :  { %v691_v33 = vpop.f32.mrf.mxu2 }
  0xb0   :  { %v227_v35 = vadd.f32 %v226_v32, %v691_v33  ;;  %v245_v36 = vmul.f32 %v691_v33, %v691_v33  ;;  %v696_v37 = vpop.f32.mrf.mxu3 }
  0xb1   :  { %v246_v38 = vmul.f32 %v696_v37, %v696_v37 }
  0xb2   :  { %v228_v39 = vadd.f32 %v227_v35, %v696_v37  ;;  %v263_v40 = vadd.f32 %v262_v34, %v245_v36 }
  0xb4   :  { %229 = vadd.xlane.f32.xlu2 %v228_v39  ;;  %v264_v41 = vadd.f32 %v263_v40, %v246_v38 }
  0xb6   :  { %265 = vadd.xlane.f32.xlu1 %v264_v41 }
 0x10f   :  { %v215_v42 = vpop.xlane.xlu0 %214 }
 0x111   :  { %v251_v43 = vpop.xlane.xlu1 %250 }
 0x117   :  { %v220_v44 = vpop.xlane.xlu0 %219 }
 0x118   :  { %v269_v48 = vadd.f32 %v220_v44, %v215_v42 }
 0x119   :  { %v256_v45 = vpop.xlane.xlu2 %255 }
 0x11a   :  { %v270_v52 = vadd.f32 %v256_v45, %v251_v43 }
 0x11f   :  { %v225_v47 = vpop.xlane.xlu1 %224 }
 0x120   :  { %v271_v53 = vadd.f32 %v269_v48, %v225_v47 }
 0x121   :  { %v261_v49 = vpop.xlane.xlu0 %260 }
 0x122   :  { %v272_v55 = vadd.f32 %v270_v52, %v261_v49 }
 0x127   :  { %v230_v54 = vpop.xlane.xlu2 %229 }
 0x128   :  { %v273_v57 = vadd.f32 %v271_v53, %v230_v54 }
 0x129   :  { %v266_v60 = vpop.xlane.xlu1 %265 }
 0x12a   :  { %v275_v62 = vmul.f32 0.00048828125, %v273_v57  ;;  %v274_v63 = vadd.f32 %v272_v55, %v266_v60 }
 0x12c   :  { %v277_v0 = vmul.f32 %v275_v62, %v275_v62  ;;  %v276_v1 = vmul.f32 0.00048828125, %v274_v63 }
 0x12e   :  { %v278_v2 = vsub.f32 %v276_v1, %v277_v0 }
 0x130   :  { %v279_v3 = vmax.f32 %v278_v2, 0.0 }
 0x132   :  { %v281_v4 = vadd.f32 1e-05, %v279_v3 }
 0x134   :  { %491 = vrsqrt.f32 %v281_v4  ;;  %vm288_vm2 = vweird.f32 %v281_v4 }
 0x13a   :  { %v492_v6 = vpop.eup %491 }
 0x13b   :  { %v283_v9 = vmul.f32 %v492_v6, %v281_v4  ;;  %vm289_vm1 = vweird.f32 %v492_v6 }
 0x13c   :  { %vm290_vm3 = vmor %vm288_vm2, %vm289_vm1 }
 0x13d   :  { %v284_v10 = vmul.f32 %v492_v6, %v283_v9 }
 0x13f   :  { %v285_v11 = vmul.f32 0.5, %v284_v10 }
 0x141   :  { %v286_v13 = vsub.f32 1.5, %v285_v11 }
 0x143   :  { %v287_v15 = vmul.f32 %v492_v6, %v286_v13 }
 0x145   :  { %v291_v16 = vsel %vm290_vm3, %v492_v6, %v287_v15 }
 0x146   :  { %v292_v17 = vmul.f32 %v291_v16, %v280_v14 }
 0x148   :  { %298 = vperm.xlu2 %489, %v292_v17   ;;  %v294_v19 = vmul.f32 %v292_v17, %v275_v62 }
 0x14a   :  { %v295_v21 = vsub.f32 %v293_v18, %v294_v19 }
 0x14c   :  { %319 = vperm.xlu0 %490, %v295_v21  }
 0x1a2   :  { %v299_v23 = vpop.permute.xlu2 %298 }
 0x1a3   :  { %v301_v26 = vmul.f32 %v299_v23, %v621_v50  ;;  %v302_v27 = vmul.f32 %v299_v23, %v623_v51  ;;  %v303_v28 = vmul.f32 %v299_v23, %v631_v56  ;;  %v304_v29 = vmul.f32 %v299_v23, %v635_v58 }
 0x1a4   :  { %v305_v30 = vmul.f32 %v299_v23, %v637_v59  ;;  %v306_v31 = vmul.f32 %v299_v23, %v640_v61  ;;  %v307_v32 = vmul.f32 %v299_v23, %v651_v5  ;;  %v308_v34 = vmul.f32 %v299_v23, %v655_v7 }
 0x1a5   :  { %v309_v35 = vmul.f32 %v299_v23, %v657_v8  ;;  %v310_v36 = vmul.f32 %v299_v23, %v662_v12  ;;  %v311_v50 = vmul.f32 %v299_v23, %v671_v20  ;;  %v312_v51 = vmul.f32 %v299_v23, %v675_v22 }
 0x1a6   :  { %v313_v56 = vmul.f32 %v299_v23, %v678_v24  ;;  %v314_v58 = vmul.f32 %v299_v23, %v680_v25  ;;  %v315_v59 = vmul.f32 %v299_v23, %v691_v33  ;;  %v316_v7 = vmul.f32 %v299_v23, %v696_v37 }
 0x1be   :  { %v320_v38 = vpop.permute.xlu0 %319 }
 0x1bf   :  { %v322_v61 = vadd.f32 %v320_v38, %v301_v26  ;;  %v323_v39 = vadd.f32 %v320_v38, %v302_v27  ;;  %v324_v5 = vadd.f32 %v320_v38, %v303_v28  ;;  %v325_v40 = vadd.f32 %v320_v38, %v304_v29 }
 0x1c0   :  { %v326_v8 = vadd.f32 %v320_v38, %v305_v30  ;;  %v327_v41 = vadd.f32 %v320_v38, %v306_v31  ;;  %v328_v12 = vadd.f32 %v320_v38, %v307_v32  ;;  %v329_v42 = vadd.f32 %v320_v38, %v308_v34 }
 0x1c1   :  { %v330_v20 = vadd.f32 %v320_v38, %v309_v35  ;;  %v331_v43 = vadd.f32 %v320_v38, %v310_v36  ;;  %v332_v22 = vadd.f32 %v320_v38, %v311_v50  ;;  %v333_v44 = vadd.f32 %v320_v38, %v312_v51 }
 0x1c2   :  { %v334_v24 = vadd.f32 %v320_v38, %v313_v56  ;;  %v335_v45 = vadd.f32 %v320_v38, %v314_v58  ;;  %v336_v25 = vadd.f32 %v320_v38, %v315_v59  ;;  %v338_v46 = vmul.f32 0.1, %v322_v61 }
 0x1c3   :  { %v339_v47 = vmul.f32 0.1, %v323_v39  ;;  %v340_v33 = vmul.f32 0.1, %v324_v5  ;;  %v337_v48 = vadd.f32 %v320_v38, %v316_v7  ;;  %v341_v49 = vmul.f32 0.1, %v325_v40 }
 0x1c4   :  { %v342_v52 = vmul.f32 0.1, %v326_v8  ;;  %v343_v53 = vmul.f32 0.1, %v327_v41  ;;  %v344_v37 = vmul.f32 0.1, %v328_v12  ;;  %v354_v57 = vmax.f32 %v322_v61, %v338_v46 }
 0x1c5   :  { %v345_v54 = vmul.f32 0.1, %v329_v42  ;;  %v346_v55 = vmul.f32 0.1, %v330_v20  ;;  %v347_v60 = vmul.f32 0.1, %v331_v43  ;;  %v355_v0 = vmax.f32 %v323_v39, %v339_v47 }
 0x1c6   :  { %v348_v62 = vmul.f32 0.1, %v332_v22  ;;  %v349_v63 = vmul.f32 0.1, %v333_v44  ;;  %v350_v1 = vmul.f32 0.1, %v334_v24  ;;  %v356_v4 = vmax.f32 %v324_v5, %v340_v33 }
 0x1c7   :  { %v351_v2 = vmul.f32 0.1, %v335_v45  ;;  %v352_v3 = vmul.f32 0.1, %v336_v25  ;;  %v353_v6 = vmul.f32 0.1, %v337_v48  ;;  %v357_v9 = vmax.f32 %v325_v40, %v341_v49 }
 0x1c8   :  { %v358_v10 = vmax.f32 %v326_v8, %v342_v52  ;;  %v359_v11 = vmax.f32 %v327_v41, %v343_v53  ;;  %v360_v13 = vmax.f32 %v328_v12, %v344_v37  ;;  %v361_v14 = vmax.f32 %v329_v42, %v345_v54 }
 0x1c9   :  { %v362_v15 = vmax.f32 %v330_v20, %v346_v55  ;;  %v363_v16 = vmax.f32 %v331_v43, %v347_v60  ;;  %v364_v17 = vmax.f32 %v332_v22, %v348_v62  ;;  %v365_v18 = vmax.f32 %v333_v44, %v349_v63 }
 0x1ca   :  { %v366_v19 = vmax.f32 %v334_v24, %v350_v1  ;;  %v367_v21 = vmax.f32 %v335_v45, %v351_v2  ;;  %v370_v23 = vpack.c.bf16 %v355_v0, %v354_v57  ;;  %v371_v26 = vpack.c.bf16 %v357_v9, %v356_v4 }
 0x1cb   :  { %v368_v27 = vmax.f32 %v336_v25, %v352_v3  ;;  %v369_v28 = vmax.f32 %v337_v48, %v353_v6  ;;  %v372_v29 = vpack.c.bf16 %v359_v11, %v358_v10  ;;  %v373_v30 = vpack.c.bf16 %v361_v14, %v360_v13 }
 0x1cc   :  { %v374_v31 = vpack.c.bf16 %v363_v16, %v362_v15  ;;  %378 = vst [vmem:[%s751_s4] sm:$0xff] %v370_v23  ;;  %v375_v32 = vpack.c.bf16 %v365_v18, %v364_v17  ;;  %v376_v34 = vpack.c.bf16 %v367_v21, %v366_v19 }
 0x1cd   :  { %379 = vst [vmem:[%s751_s4 + $0x8] sm:$0xff] %v371_v26  ;;  %v377_v35 = vpack.c.bf16 %v369_v28, %v368_v27 }
 0x1ce   :  { %380 = vst [vmem:[%s751_s4 + $0x10] sm:$0xff] %v372_v29 }
 0x1cf   :  { %381 = vst [vmem:[%s751_s4 + $0x18] sm:$0xff] %v373_v30 }
 0x1d0   :  { %382 = vst [vmem:[%s751_s4 + $0x20] sm:$0xff] %v374_v31 }
 0x1d1   :  { %383 = vst [vmem:[%s751_s4 + $0x28] sm:$0xff] %v375_v32 }
 0x1d2   :  { %384 = vst [vmem:[%s751_s4 + $0x30] sm:$0xff] %v376_v34 }
 0x1d3   :  { %385 = vst [vmem:[%s751_s4 + $0x38] sm:$0xff] %v377_v35 }

</bundles_post_ra>
